<compile_context>
chip_gen: v5e
topology: v5e:2x2
jax: 0.10.0
libtpu: 0.0.40
codegen_flags: <defaults>
</compile_context>

<pallas_src>
import functools

import jax
import jax.numpy as jnp
from jax.experimental import pallas as pl
from jax.experimental.pallas import tpu as pltpu


def _conv_bn_relu_kernel(x_ref, w_ref, m_ref, b_ref, o_ref, acc_ref, *, H, W):
    """One (image, cin-tile) grid step of fused 3x3 conv + folded BN + ReLU.

    x_ref  : (cin_t, (H+4)*W)  compute dtype  rows-padded, flattened activations
    w_ref  : (9, Cout, cin_t)  compute dtype  BN-scale-folded weights, tap = ky*3+kx
    m_ref  : (2, H*W)          f32            column masks for kx=0 / kx=2 taps
    b_ref  : (Cout, 1)         f32            folded bias (BN shift + conv bias)
    o_ref  : (Cout, H*W)       out dtype
    acc_ref: (Cout, H*W)       f32            accumulator across the cin-tile axis
    """
    HW = H * W
    k = pl.program_id(1)

    @pl.when(k == 0)
    def _init():
        acc_ref[...] = jnp.zeros_like(acc_ref)

    acc = acc_ref[...]
    for kx in range(3):
        part = None
        for ky in range(3):
            # tap (ky, kx) of output pixel s = h*W + w lives at flat index
            # s + (ky+1)*W + (kx-1) of the rows-padded, flattened input.
            start = (ky + 1) * W + (kx - 1)
            tap = x_ref[:, start:start + HW]                    # (cin_t, HW)
            p = jnp.dot(w_ref[ky * 3 + kx], tap,
                        preferred_element_type=jnp.float32)     # (Cout, HW) f32
            part = p if part is None else part + p
        # Left / right image-edge columns wrapped to the neighbouring row: mask.
        if kx == 0:
            part = part * m_ref[0:1, :]
        elif kx == 2:
            part = part * m_ref[1:2, :]
        acc = acc + part
    acc_ref[...] = acc

    @pl.when(k == pl.num_programs(1) - 1)
    def _finalize():
        y = acc_ref[...] + b_ref[...]                           # folded bias
        o_ref[...] = jnp.maximum(y, 0.0).astype(o_ref.dtype)    # ReLU


def _vmem_capacity_bytes():
    cap = 64 * 1024 * 1024          # conservative fallback (v7x per-TC VMEM)
    try:
        info = pltpu.get_tpu_info()
        cap = int(getattr(info, "vmem_capacity_bytes", cap)) or cap
    except Exception:               # pragma: no cover - off-TPU / older jax
        pass
    return cap


def conv3x3_bn_relu(x, weight, conv_bias, gamma, beta, run_mean, run_var,
                    *, eps=1e-5, compute_dtype=jnp.bfloat16):
    """Fused Conv2d(k=3, pad=1, stride=1) + BatchNorm2d(eval) + ReLU.  NCHW in/out."""
    N, Cin, H, W = x.shape
    Cout = weight.shape[0]
    HW = H * W
    Lp = (H + 4) * W
    out_dtype = x.dtype

    # ---- fold BN (running stats): scale -> weights, shift (+conv bias) -> bias.
    scale = gamma.astype(jnp.float32) / jnp.sqrt(run_var.astype(jnp.float32) + eps)
    bias = (beta.astype(jnp.float32)
            + scale * (conv_bias.astype(jnp.float32) - run_mean.astype(jnp.float32)))
    w_folded = weight.astype(jnp.float32) * scale[:, None, None, None]   # (Cout,Cin,3,3)
    # tap-major layout: w9[ky*3 + kx] == w_folded[:, :, ky, kx]
    w9 = jnp.transpose(w_folded, (2, 3, 0, 1)).reshape(9, Cout, Cin).astype(compute_dtype)

    # ---- rows-only zero pad (2 top / 2 bottom), single cast, flatten spatial.
    xg = jnp.pad(x, ((0, 0), (0, 0), (2, 2), (0, 0))).astype(compute_dtype)
    xg = xg.reshape(N, Cin, Lp)

    # Column masks (f32): kill the wrapped columns of the kx=0 / kx=2 taps.
    col = jnp.arange(HW, dtype=jnp.int32) % W
    masks = jnp.stack([(col != 0), (col != W - 1)]).astype(jnp.float32)  # (2, HW)

    # ---- per-generation VMEM budget -> optional Cin-reduction tiling.
    act_bytes = jnp.dtype(compute_dtype).itemsize
    out_bytes = jnp.dtype(out_dtype).itemsize
    vmem_cap = _vmem_capacity_bytes()
    budget = int(0.6 * vmem_cap)

    def vmem_cost(ct):
        return (2 * ct * Lp * act_bytes             # activations (double-buffered)
                + 2 * 9 * Cout * ct * act_bytes     # weights     (double-buffered)
                + 2 * Cout * HW * out_bytes         # output      (double-buffered)
                + Cout * HW * 4                     # f32 accumulator scratch
                + 2 * (2 * HW + Cout) * 4)          # masks + bias

    if Cin <= 128 or vmem_cost(Cin) <= budget:
        cin_t = Cin
    else:
        cin_t = max(128, (Cin // 128) * 128)
        while cin_t > 128 and vmem_cost(cin_t) > budget:
            cin_t -= 128
    cin_p = ((Cin + cin_t - 1) // cin_t) * cin_t
    if cin_p != Cin:                 # zero channels contribute nothing
        xg = jnp.pad(xg, ((0, 0), (0, cin_p - Cin), (0, 0)))
        w9 = jnp.pad(w9, ((0, 0), (0, 0), (0, cin_p - Cin)))
    n_k = cin_p // cin_t

    kernel = functools.partial(_conv_bn_relu_kernel, H=H, W=W)

    out = pl.pallas_call(
        kernel,
        out_shape=jax.ShapeDtypeStruct((N, Cout, HW), out_dtype),
        grid=(N, n_k),
        in_specs=[
            pl.BlockSpec((None, cin_t, Lp), lambda n, k: (n, k, 0)),   # activations
            # The blocks below have a (nearly) constant block index, so the
            # pipeline keeps them resident and skips re-fetching per step.
            pl.BlockSpec((9, Cout, cin_t), lambda n, k: (0, 0, k)),    # weights
            pl.BlockSpec((2, HW), lambda n, k: (0, 0)),                # edge masks
            pl.BlockSpec((Cout, 1), lambda n, k: (0, 0)),              # folded bias
        ],
        out_specs=pl.BlockSpec((None, Cout, HW), lambda n, k: (n, 0, 0)),
        scratch_shapes=[pltpu.VMEM((Cout, HW), jnp.float32)],
        compiler_params=pltpu.CompilerParams(
            dimension_semantics=("parallel", "arbitrary"),
            vmem_limit_bytes=min(int(0.85 * vmem_cap), 96 * 1024 * 1024)),
    )(xg, w9, masks, bias.reshape(Cout, 1))

    # Contiguous reshape back to NCHW: metadata only, no extra HBM pass.
    return out.reshape(N, Cout, H, W)


def bottleneck_forward(x, p, *, compute_dtype=jnp.bfloat16):
    """Bottleneck.forward: (conv3x3 -> BN -> ReLU) x 2."""
    y = conv3x3_bn_relu(x, p["w1"], p["b1"], p["g1"], p["be1"], p["rm1"], p["rv1"],
                        compute_dtype=compute_dtype)
    y = conv3x3_bn_relu(y, p["w2"], p["b2"], p["g2"], p["be2"], p["rm2"], p["rv2"],
                        compute_dtype=compute_dtype)
    return y


# ----------------------------- references (plain JAX) -----------------------------
def _ref_block_f32(x, w, b, g, be, rm, rv, eps=1e-5):
    """Exact eval-mode Conv+BN+ReLU in f32 (mirrors the PyTorch module)."""
    y = jax.lax.conv_general_dilated(
        x, w, window_strides=(1, 1), padding=((1, 1), (1, 1)),
        dimension_numbers=("NCHW", "OIHW", "NCHW"),
        precision=jax.lax.Precision.HIGHEST)
    y = y + b[None, :, None, None]
    y = (y - rm[None, :, None, None]) / jnp.sqrt(rv[None, :, None, None] + eps)
    y = y * g[None, :, None, None] + be[None, :, None, None]
    return jnp.maximum(y, 0.0)


def _ref_block_mxu(x, w, b, g, be, rm, rv, eps=1e-5, compute_dtype=jnp.bfloat16):
    """Mirrors the kernel arithmetic exactly: BN scale folded into compute-dtype
    weights, compute-dtype activations, f32 accumulation / bias / ReLU."""
    scale = g / jnp.sqrt(rv + eps)
    bias = be + scale * (b - rm)
    wf = (w * scale[:, None, None, None]).astype(compute_dtype).astype(jnp.float32)
    xf = x.astype(compute_dtype).astype(jnp.float32)
    y = jax.lax.conv_general_dilated(
        xf, wf, window_strides=(1, 1), padding=((1, 1), (1, 1)),
        dimension_numbers=("NCHW", "OIHW", "NCHW"),
        precision=jax.lax.Precision.HIGHEST)
    y = y + bias[None, :, None, None]
    return jnp.maximum(y, 0.0)


if __name__ == "__main__":
    key = jax.random.PRNGKey(0)
    keys = jax.random.split(key, 13)

    N, Cin, Cout, H, W = 2, 4, 8, 16, 16
    x = jax.random.normal(keys[0], (N, Cin, H, W), dtype=jnp.float32)

    def conv_init(kw, kb, cin, cout):
        bound = 1.0 / (cin * 9) ** 0.5      # nn.Conv2d default: U(+-1/sqrt(fan_in))
        w = jax.random.uniform(kw, (cout, cin, 3, 3), jnp.float32, -bound, bound)
        b = jax.random.uniform(kb, (cout,), jnp.float32, -bound, bound)
        return w, b

    def bn_init(kg, kb, km, kv, c):
        g = jax.random.uniform(kg, (c,), jnp.float32, 0.5, 1.5)
        be = jax.random.uniform(kb, (c,), jnp.float32, -0.5, 0.5)
        rm = jax.random.uniform(km, (c,), jnp.float32, -0.5, 0.5)
        rv = jax.random.uniform(kv, (c,), jnp.float32, 0.5, 1.5)
        return g, be, rm, rv

    w1, b1 = conv_init(keys[1], keys[2], Cin, Cout)
    g1, be1, rm1, rv1 = bn_init(keys[3], keys[4], keys[5], keys[6], Cout)
    w2, b2 = conv_init(keys[7], keys[8], Cout, Cout)
    g2, be2, rm2, rv2 = bn_init(keys[9], keys[10], keys[11], keys[12], Cout)

    params = dict(w1=w1, b1=b1, g1=g1, be1=be1, rm1=rm1, rv1=rv1,
                  w2=w2, b2=b2, g2=g2, be2=be2, rm2=rm2, rv2=rv2)

    # --- main path: bf16 MXU operands, f32 accumulation / epilogue.
    y = bottleneck_forward(x, params)
    jax.block_until_ready(y)
    assert y.shape == (N, Cout, H, W)

    # 1) Full-precision path of the same kernel vs. the f32 module reference.
    y_f32 = bottleneck_forward(x, params, compute_dtype=jnp.float32)
    jax.block_until_ready(y_f32)
    r_f32 = _ref_block_f32(_ref_block_f32(x, w1, b1, g1, be1, rm1, rv1),
                           w2, b2, g2, be2, rm2, rv2)
    e0 = float(jnp.max(jnp.abs(y_f32 - r_f32)))
    assert jnp.allclose(y_f32, r_f32, atol=1e-4, rtol=1e-4), e0

    # 2) Tight per-layer check of the bf16 path vs. a reference that mirrors the
    #    kernel arithmetic exactly (bf16 operands, f32 accumulation).
    y1 = conv3x3_bn_relu(x, w1, b1, g1, be1, rm1, rv1)
    r1 = _ref_block_mxu(x, w1, b1, g1, be1, rm1, rv1)
    r2 = _ref_block_mxu(y1, w2, b2, g2, be2, rm2, rv2)
    e1 = float(jnp.max(jnp.abs(y1 - r1)))
    e2 = float(jnp.max(jnp.abs(y - r2)))
    assert jnp.allclose(y1, r1, atol=1e-4, rtol=1e-4), e1
    assert jnp.allclose(y, r2, atol=1e-4, rtol=1e-4), e2

    # 3) Loose sanity check: bf16-operand quantization vs. the pure f32 module.
    ef = float(jnp.max(jnp.abs(y - r_f32)))
    assert jnp.allclose(y, r_f32, atol=3e-2, rtol=3e-2), ef

    print("KERNEL_OK")
</pallas_src>

<mosaic_0001>
module attributes {stable_mosaic.version = 11 : i64} {
  func.func @_conv_bn_relu_kernel(%arg0: i32, %arg1: i32, %arg2: memref<1x4x320xbf16, #tpu.memory_space<vmem>>, %arg3: memref<9x8x4xbf16, #tpu.memory_space<vmem>>, %arg4: memref<2x256xf32, #tpu.memory_space<vmem>>, %arg5: memref<8x1xf32, #tpu.memory_space<vmem>>, %arg6: memref<1x8x256xf32, #tpu.memory_space<vmem>>, %arg7: memref<8x256xf32, #tpu.memory_space<vmem>>) attributes {dimension_semantics = [#tpu.dimension_semantics<parallel>, #tpu.dimension_semantics<arbitrary>], iteration_bounds = array<i64: 2, 1>, scalar_prefetch = 0 : i64, scratch_operands = 1 : i64, tpu.core_type = #tpu.core_type<tc>, window_params = [{transform_indices = @transform_0, window_bounds = array<i64: 1, 4, 320>}, {transform_indices = @transform_1, window_bounds = array<i64: 9, 8, 4>}, {pipeline_mode = #tpu.pipeline_mode<synchronous>, transform_indices = @transform_2, window_bounds = array<i64: 2, 256>}, {pipeline_mode = #tpu.pipeline_mode<synchronous>, transform_indices = @transform_3, window_bounds = array<i64: 8, 1>}, {transform_indices = @transform_4, window_bounds = array<i64: 1, 8, 256>}]} {
    %c0_i32 = arith.constant 0 : i32
    %0 = arith.cmpi eq, %arg1, %c0_i32 : i32
    %1 = arith.extui %0 : i1 to i32
    %c0_i32_0 = arith.constant 0 : i32
    %2 = arith.cmpi ne, %1, %c0_i32_0 : i32
    scf.if %2 {
      %cst_55 = arith.constant 0.000000e+00 : f32
      %68 = vector.broadcast %cst_55 : f32 to vector<8x256xf32>
      %c0_56 = arith.constant 0 : index
      %c0_57 = arith.constant 0 : index
      %69 = vector.load %arg7[%c0_56, %c0_57] : memref<8x256xf32, #tpu.memory_space<vmem>>, vector<8x256xf32>
      tpu.vector_store %arg7[%c0_56, %c0_57], %68 {strides = array<i32>} : memref<8x256xf32, #tpu.memory_space<vmem>>, vector<8x256xf32>,
    } else {
    }
    %c0 = arith.constant 0 : index
    %c0_1 = arith.constant 0 : index
    %3 = vector.load %arg7[%c0, %c0_1] : memref<8x256xf32, #tpu.memory_space<vmem>>, vector<8x256xf32>
    %c0_2 = arith.constant 0 : index
    %c0_3 = arith.constant 0 : index
    %c15 = arith.constant 15 : index
    %4 = vector.load %arg2[%c0_2, %c0_3, %c15] : memref<1x4x320xbf16, #tpu.memory_space<vmem>>, vector<1x4x256xbf16>
    %5 = vector.shape_cast %4 : vector<1x4x256xbf16> to vector<4x256xbf16>
    %c0_4 = arith.constant 0 : index
    %c0_5 = arith.constant 0 : index
    %c0_6 = arith.constant 0 : index
    %6 = vector.load %arg3[%c0_4, %c0_5, %c0_6] : memref<9x8x4xbf16, #tpu.memory_space<vmem>>, vector<1x8x4xbf16>
    %7 = vector.shape_cast %6 : vector<1x8x4xbf16> to vector<8x4xbf16>
    %cst = arith.constant dense<0.000000e+00> : vector<8x256xf32>
    %8 = tpu.matmul %7, %5, %cst {dimension_numbers = #tpu.dot_dimension_numbers<[1], [0], [0], [1], [0, 0, 1, 1], [], []>} : vector<8x4xbf16>, vector<4x256xbf16>, vector<8x256xf32> -> vector<8x256xf32>
    %c0_7 = arith.constant 0 : index
    %c0_8 = arith.constant 0 : index
    %c31 = arith.constant 31 : index
    %9 = vector.load %arg2[%c0_7, %c0_8, %c31] : memref<1x4x320xbf16, #tpu.memory_space<vmem>>, vector<1x4x256xbf16>
    %10 = vector.shape_cast %9 : vector<1x4x256xbf16> to vector<4x256xbf16>
    %c3 = arith.constant 3 : index
    %c0_9 = arith.constant 0 : index
    %c0_10 = arith.constant 0 : index
    %11 = vector.load %arg3[%c3, %c0_9, %c0_10] : memref<9x8x4xbf16, #tpu.memory_space<vmem>>, vector<1x8x4xbf16>
    %12 = vector.shape_cast %11 : vector<1x8x4xbf16> to vector<8x4xbf16>
    %cst_11 = arith.constant dense<0.000000e+00> : vector<8x256xf32>
    %13 = tpu.matmul %12, %10, %cst_11 {dimension_numbers = #tpu.dot_dimension_numbers<[1], [0], [0], [1], [0, 0, 1, 1], [], []>} : vector<8x4xbf16>, vector<4x256xbf16>, vector<8x256xf32> -> vector<8x256xf32>
    %14 = arith.addf %8, %13 : vector<8x256xf32>
    %c0_12 = arith.constant 0 : index
    %c0_13 = arith.constant 0 : index
    %c47 = arith.constant 47 : index
    %15 = vector.load %arg2[%c0_12, %c0_13, %c47] : memref<1x4x320xbf16, #tpu.memory_space<vmem>>, vector<1x4x256xbf16>
    %16 = vector.shape_cast %15 : vector<1x4x256xbf16> to vector<4x256xbf16>
    %c6 = arith.constant 6 : index
    %c0_14 = arith.constant 0 : index
    %c0_15 = arith.constant 0 : index
    %17 = vector.load %arg3[%c6, %c0_14, %c0_15] : memref<9x8x4xbf16, #tpu.memory_space<vmem>>, vector<1x8x4xbf16>
    %18 = vector.shape_cast %17 : vector<1x8x4xbf16> to vector<8x4xbf16>
    %cst_16 = arith.constant dense<0.000000e+00> : vector<8x256xf32>
    %19 = tpu.matmul %18, %16, %cst_16 {dimension_numbers = #tpu.dot_dimension_numbers<[1], [0], [0], [1], [0, 0, 1, 1], [], []>} : vector<8x4xbf16>, vector<4x256xbf16>, vector<8x256xf32> -> vector<8x256xf32>
    %20 = arith.addf %14, %19 : vector<8x256xf32>
    %c0_17 = arith.constant 0 : index
    %c0_18 = arith.constant 0 : index
    %21 = vector.load %arg4[%c0_17, %c0_18] : memref<2x256xf32, #tpu.memory_space<vmem>>, vector<1x256xf32>
    %22 = vector.broadcast %21 : vector<1x256xf32> to vector<8x256xf32>
    %23 = arith.mulf %20, %22 : vector<8x256xf32>
    %24 = arith.addf %3, %23 : vector<8x256xf32>
    %c0_19 = arith.constant 0 : index
    %c0_20 = arith.constant 0 : index
    %c16 = arith.constant 16 : index
    %25 = vector.load %arg2[%c0_19, %c0_20, %c16] : memref<1x4x320xbf16, #tpu.memory_space<vmem>>, vector<1x4x256xbf16>
    %26 = vector.shape_cast %25 : vector<1x4x256xbf16> to vector<4x256xbf16>
    %c1 = arith.constant 1 : index
    %c0_21 = arith.constant 0 : index
    %c0_22 = arith.constant 0 : index
    %27 = vector.load %arg3[%c1, %c0_21, %c0_22] : memref<9x8x4xbf16, #tpu.memory_space<vmem>>, vector<1x8x4xbf16>
    %28 = vector.shape_cast %27 : vector<1x8x4xbf16> to vector<8x4xbf16>
    %cst_23 = arith.constant dense<0.000000e+00> : vector<8x256xf32>
    %29 = tpu.matmul %28, %26, %cst_23 {dimension_numbers = #tpu.dot_dimension_numbers<[1], [0], [0], [1], [0, 0, 1, 1], [], []>} : vector<8x4xbf16>, vector<4x256xbf16>, vector<8x256xf32> -> vector<8x256xf32>
    %c0_24 = arith.constant 0 : index
    %c0_25 = arith.constant 0 : index
    %c32 = arith.constant 32 : index
    %30 = vector.load %arg2[%c0_24, %c0_25, %c32] : memref<1x4x320xbf16, #tpu.memory_space<vmem>>, vector<1x4x256xbf16>
    %31 = vector.shape_cast %30 : vector<1x4x256xbf16> to vector<4x256xbf16>
    %c4 = arith.constant 4 : index
    %c0_26 = arith.constant 0 : index
    %c0_27 = arith.constant 0 : index
    %32 = vector.load %arg3[%c4, %c0_26, %c0_27] : memref<9x8x4xbf16, #tpu.memory_space<vmem>>, vector<1x8x4xbf16>
    %33 = vector.shape_cast %32 : vector<1x8x4xbf16> to vector<8x4xbf16>
    %cst_28 = arith.constant dense<0.000000e+00> : vector<8x256xf32>
    %34 = tpu.matmul %33, %31, %cst_28 {dimension_numbers = #tpu.dot_dimension_numbers<[1], [0], [0], [1], [0, 0, 1, 1], [], []>} : vector<8x4xbf16>, vector<4x256xbf16>, vector<8x256xf32> -> vector<8x256xf32>
    %35 = arith.addf %29, %34 : vector<8x256xf32>
    %c0_29 = arith.constant 0 : index
    %c0_30 = arith.constant 0 : index
    %c48 = arith.constant 48 : index
    %36 = vector.load %arg2[%c0_29, %c0_30, %c48] : memref<1x4x320xbf16, #tpu.memory_space<vmem>>, vector<1x4x256xbf16>
    %37 = vector.shape_cast %36 : vector<1x4x256xbf16> to vector<4x256xbf16>
    %c7 = arith.constant 7 : index
    %c0_31 = arith.constant 0 : index
    %c0_32 = arith.constant 0 : index
    %38 = vector.load %arg3[%c7, %c0_31, %c0_32] : memref<9x8x4xbf16, #tpu.memory_space<vmem>>, vector<1x8x4xbf16>
    %39 = vector.shape_cast %38 : vector<1x8x4xbf16> to vector<8x4xbf16>
    %cst_33 = arith.constant dense<0.000000e+00> : vector<8x256xf32>
    %40 = tpu.matmul %39, %37, %cst_33 {dimension_numbers = #tpu.dot_dimension_numbers<[1], [0], [0], [1], [0, 0, 1, 1], [], []>} : vector<8x4xbf16>, vector<4x256xbf16>, vector<8x256xf32> -> vector<8x256xf32>
    %41 = arith.addf %35, %40 : vector<8x256xf32>
    %42 = arith.addf %24, %41 : vector<8x256xf32>
    %c0_34 = arith.constant 0 : index
    %c0_35 = arith.constant 0 : index
    %c17 = arith.constant 17 : index
    %43 = vector.load %arg2[%c0_34, %c0_35, %c17] : memref<1x4x320xbf16, #tpu.memory_space<vmem>>, vector<1x4x256xbf16>
    %44 = vector.shape_cast %43 : vector<1x4x256xbf16> to vector<4x256xbf16>
    %c2 = arith.constant 2 : index
    %c0_36 = arith.constant 0 : index
    %c0_37 = arith.constant 0 : index
    %45 = vector.load %arg3[%c2, %c0_36, %c0_37] : memref<9x8x4xbf16, #tpu.memory_space<vmem>>, vector<1x8x4xbf16>
    %46 = vector.shape_cast %45 : vector<1x8x4xbf16> to vector<8x4xbf16>
    %cst_38 = arith.constant dense<0.000000e+00> : vector<8x256xf32>
    %47 = tpu.matmul %46, %44, %cst_38 {dimension_numbers = #tpu.dot_dimension_numbers<[1], [0], [0], [1], [0, 0, 1, 1], [], []>} : vector<8x4xbf16>, vector<4x256xbf16>, vector<8x256xf32> -> vector<8x256xf32>
    %c0_39 = arith.constant 0 : index
    %c0_40 = arith.constant 0 : index
    %c33 = arith.constant 33 : index
    %48 = vector.load %arg2[%c0_39, %c0_40, %c33] : memref<1x4x320xbf16, #tpu.memory_space<vmem>>, vector<1x4x256xbf16>
    %49 = vector.shape_cast %48 : vector<1x4x256xbf16> to vector<4x256xbf16>
    %c5 = arith.constant 5 : index
    %c0_41 = arith.constant 0 : index
    %c0_42 = arith.constant 0 : index
    %50 = vector.load %arg3[%c5, %c0_41, %c0_42] : memref<9x8x4xbf16, #tpu.memory_space<vmem>>, vector<1x8x4xbf16>
    %51 = vector.shape_cast %50 : vector<1x8x4xbf16> to vector<8x4xbf16>
    %cst_43 = arith.constant dense<0.000000e+00> : vector<8x256xf32>
    %52 = tpu.matmul %51, %49, %cst_43 {dimension_numbers = #tpu.dot_dimension_numbers<[1], [0], [0], [1], [0, 0, 1, 1], [], []>} : vector<8x4xbf16>, vector<4x256xbf16>, vector<8x256xf32> -> vector<8x256xf32>
    %53 = arith.addf %47, %52 : vector<8x256xf32>
    %c0_44 = arith.constant 0 : index
    %c0_45 = arith.constant 0 : index
    %c49 = arith.constant 49 : index
    %54 = vector.load %arg2[%c0_44, %c0_45, %c49] : memref<1x4x320xbf16, #tpu.memory_space<vmem>>, vector<1x4x256xbf16>
    %55 = vector.shape_cast %54 : vector<1x4x256xbf16> to vector<4x256xbf16>
    %c8 = arith.constant 8 : index
    %c0_46 = arith.constant 0 : index
    %c0_47 = arith.constant 0 : index
    %56 = vector.load %arg3[%c8, %c0_46, %c0_47] : memref<9x8x4xbf16, #tpu.memory_space<vmem>>, vector<1x8x4xbf16>
    %57 = vector.shape_cast %56 : vector<1x8x4xbf16> to vector<8x4xbf16>
    %cst_48 = arith.constant dense<0.000000e+00> : vector<8x256xf32>
    %58 = tpu.matmul %57, %55, %cst_48 {dimension_numbers = #tpu.dot_dimension_numbers<[1], [0], [0], [1], [0, 0, 1, 1], [], []>} : vector<8x4xbf16>, vector<4x256xbf16>, vector<8x256xf32> -> vector<8x256xf32>
    %59 = arith.addf %53, %58 : vector<8x256xf32>
    %c1_49 = arith.constant 1 : index
    %c0_50 = arith.constant 0 : index
    %60 = vector.load %arg4[%c1_49, %c0_50] : memref<2x256xf32, #tpu.memory_space<vmem>>, vector<1x256xf32>
    %61 = vector.broadcast %60 : vector<1x256xf32> to vector<8x256xf32>
    %62 = arith.mulf %59, %61 : vector<8x256xf32>
    %63 = arith.addf %42, %62 : vector<8x256xf32>
    %c0_51 = arith.constant 0 : index
    %c0_52 = arith.constant 0 : index
    %64 = vector.load %arg7[%c0_51, %c0_52] : memref<8x256xf32, #tpu.memory_space<vmem>>, vector<8x256xf32>
    tpu.vector_store %arg7[%c0_51, %c0_52], %63 {strides = array<i32>} : memref<8x256xf32, #tpu.memory_space<vmem>>, vector<8x256xf32>,
    %c0_i32_53 = arith.constant 0 : i32
    %65 = arith.cmpi eq, %arg1, %c0_i32_53 : i32
    %66 = arith.extui %65 : i1 to i32
    %c0_i32_54 = arith.constant 0 : i32
    %67 = arith.cmpi ne, %66, %c0_i32_54 : i32
    scf.if %67 {
      %c0_55 = arith.constant 0 : index
      %c0_56 = arith.constant 0 : index
      %68 = vector.load %arg7[%c0_55, %c0_56] : memref<8x256xf32, #tpu.memory_space<vmem>>, vector<8x256xf32>
      %c0_57 = arith.constant 0 : index
      %c0_58 = arith.constant 0 : index
      %69 = vector.load %arg5[%c0_57, %c0_58] : memref<8x1xf32, #tpu.memory_space<vmem>>, vector<8x1xf32>
      %70 = vector.broadcast %69 : vector<8x1xf32> to vector<8x256xf32>
      %71 = arith.addf %68, %70 : vector<8x256xf32>
      %cst_59 = arith.constant 0.000000e+00 : f32
      %72 = vector.broadcast %cst_59 : f32 to vector<8x256xf32>
      %73 = arith.maximumf %71, %72 : vector<8x256xf32>
      %c0_60 = arith.constant 0 : index
      %c0_61 = arith.constant 0 : index
      %c0_62 = arith.constant 0 : index
      %74 = vector.load %arg6[%c0_60, %c0_61, %c0_62] : memref<1x8x256xf32, #tpu.memory_space<vmem>>, vector<1x8x256xf32>
      %75 = vector.shape_cast %74 : vector<1x8x256xf32> to vector<8x256xf32>
      %76 = vector.shape_cast %73 : vector<8x256xf32> to vector<1x8x256xf32>
      tpu.vector_store %arg6[%c0_60, %c0_61, %c0_62], %76 {strides = array<i32>} : memref<1x8x256xf32, #tpu.memory_space<vmem>>, vector<1x8x256xf32>,
    } else {
    }
    return
  }
  func.func @transform_0(%arg0: i32, %arg1: i32) -> (i32, i32, i32) {
    %c0_i32 = arith.constant 0 : i32
    %c0_i32_0 = arith.constant 0 : i32
    return %arg0, %arg1, %c0_i32 : i32, i32, i32
  }
  func.func @transform_1(%arg0: i32, %arg1: i32) -> (i32, i32, i32) {
    %c0_i32 = arith.constant 0 : i32
    %c0_i32_0 = arith.constant 0 : i32
    %c0_i32_1 = arith.constant 0 : i32
    return %c0_i32, %c0_i32_0, %arg1 : i32, i32, i32
  }
  func.func @transform_2(%arg0: i32, %arg1: i32) -> (i32, i32) {
    %c0_i32 = arith.constant 0 : i32
    %c0_i32_0 = arith.constant 0 : i32
    %c0_i32_1 = arith.constant 0 : i32
    return %c0_i32, %c0_i32_0 : i32, i32
  }
  func.func @transform_3(%arg0: i32, %arg1: i32) -> (i32, i32) {
    %c0_i32 = arith.constant 0 : i32
    %c0_i32_0 = arith.constant 0 : i32
    %c0_i32_1 = arith.constant 0 : i32
    return %c0_i32, %c0_i32_0 : i32, i32
  }
  func.func @transform_4(%arg0: i32, %arg1: i32) -> (i32, i32, i32) {
    %c0_i32 = arith.constant 0 : i32
    %c0_i32_0 = arith.constant 0 : i32
    %c0_i32_1 = arith.constant 0 : i32
    return %arg0, %c0_i32, %c0_i32_0 : i32, i32, i32
  }
}

</mosaic_0001>

<bundles_post_ra>
// kernel: tpu_custom_call.1
= control target key start
LH: loop header
LB: loop body
LE: loop exit
PB: predicated region body
PF: predicated region fallthrough
CT: control target
= control target key end

     0   :  { %9 = vsyncpa [#allocation4], 0  ;;  %s1300_s0 = inlined_call_operand.vmem [shape: bf16[2,4,320], index: 0, kind: input, shape index: {}]   ;;  %s1301_s1 = inlined_call_operand.vmem [shape: bf16[9,8,4], index: 1, kind: input, shape index: {}]   ;;  %s1302_s2 = inlined_call_operand.vmem [shape: f32[2,256], index: 2, kind: input, shape index: {}]   ;;  %s1303_s3 = inlined_call_operand.vmem [shape: f32[8,1], index: 3, kind: input, shape index: {}]   ;;  %s1304_s4 = inlined_call_operand.hbm [shape: f32[2,8,256], index: 4, kind: output, shape index: {}]  }
   0x1   :  { %11 = vsyncpa [#allocation4 + $0x1], 0  ;;  %s1117_s15 = smov 0   ;;  %s1119_s16 = smov 0  }
   0x2   :  { %s1121_s17 = smov 0   ;;  %s1123_s18 = smov 0  }
   0x3   :  { %s1125_s19 = smov 0   ;;  %s1127_s20 = smov 0  }
   0x4 LB: > { %s894_s21 = sadd.s32 4294967295, %s1080_s20   ;;  %s895_s22 = sadd.s32 4294967294, %s1080_s20   ;;  %s1080_s20 = sphi %s1127_s20, %s17_s20   ;;  %s1076_s19 = sphi %s1125_s19, %s1311_s19   ;;  %s1072_s18 = sphi %s1123_s18, %s1310_s18   ;;  %s1068_s17 = sphi %s1121_s17, %s1309_s17   ;;  %s1064_s16 = sphi %s1119_s16, %s1308_s16   ;;  %s1060_s15 = sphi %s1117_s15, %s1307_s15  }
   0x5   : > { %s29_s23 = sadd.s32 1, %s1076_s19  ;;  %s132_s24 = sadd.s32 1, %s1068_s17 }
   0x6   : > { %p31_p0 = scmp.ge.s32.totalorder %s29_s23, 2  ;;  %p142_p1 = scmp.ne.s32.totalorder %s1068_s17, %s1064_s16 }
   0x7   : > { %p143_p2 = scmp.eq.s32.totalorder %s894_s21, 1  ;;  %p148_p3 = scmp.ne.s32.totalorder %s1064_s16, %s1060_s15 }
   0x8   : > { %s1313_s23 = smov (%p31_p0, %s29_s23), 0  ;;  %p149_p5 = scmp.eq.s32.totalorder %s895_s22, 1 }
   0x9   : > { %p1157_p4 = por %p143_p2, %p142_p1  ;;  %s129_s26 = ssub.s32 %s1076_s19, %s1313_s23 }
   0xa   : > { %p899_p6 = scmp.ge.s32.totalorder %s1080_s20, 1  ;;  %p130_p7 = scmp.eq.s32.totalorder %s129_s26, 0 }
   0xb   : > { %p1164_p8 = por %p149_p5, %p148_p3  ;;  %p192_p9 = scmp.lt.s32.totalorder %s1080_s20, 3 }
   0xc   : > { %s1170_s28 = scalar_select %p130_p7, %s1068_s17, %s132_s24  }
   0xd   : > { %p193_p10 = pnand %p899_p6, %p192_p9 }
   0xe   : > { %p226_p11 = scmp.lt.s32.totalorder (!%p193_p10), %s1072_s18, 1  ;;  %s1082_s8 = smov (!%p193_p10), 97  }
   0xf   : > { %196 = sbr.rel (%p193_p10) target bundleno = 366 (0x16e), region = 36  ;;  %s1083_s9 = smov (!%p193_p10), 113  }
  0x10   : > { %s1084_s10 = smov (!%p193_p10), 81   ;;  %s1085_s11 = smov (!%p193_p10), 96  }
  0x11   : > { %s1086_s12 = smov (!%p193_p10), 112   ;;  %s1087_s13 = smov (!%p193_p10), 80  }
  0x12   : > { %s1088_s14 = smov (!%p193_p10), 95   ;;  %s1089_s21 = smov (!%p193_p10), 111  }
  0x13   : > { %s1090_s22 = smov (!%p193_p10), 79   ;;  %s1022_s6 = scalar_lea.hbm (!%p193_p10), %s1304_s4, 32 }
  0x14   : > { %s227_s29 = scalar_select %p226_p11, %s1072_s18, 1  ;;  %vm319_vm0 = vcmask 924672   ;;  %vm273_vm1 = vcmask 1041408   ;;  %v249_v37 = vld [vmem:[%s1301_s1] sm:$0xf]  ;;  %vm269_vm2 = vcmask 31744  }
  0x15   : > { %vm266_vm3 = vcmask 793600   ;;  %v902_v48 = vld [vmem:[%s1301_s1 + $0xc] sm:$0xf]  ;;  %vm374_vm4 = vcmask 662528   ;;  %vm443_vm5 = vcmask 785408   ;;  %vm494_vm6 = vcmask 916480  }
  0x16   : > { %s935_s30 = smul.u32 6, %s227_s29  ;;  %v907_v58 = vld [vmem:[%s1301_s1 + $0x18] sm:$0xf]  ;;  %vm549_vm7 = vcmask 654336   ;;  %vm610_vm8 = vcmask 777216   ;;  %vm661_vm9 = vcmask 908288  }
  0x17   : > { %vm716_vm10 = vcmask 646144  }
  0x18   : > { %s1177_s7 = scalar_lea.vmem %s1300_s0, %s935_s30 }
  0x19   : > { %v248_v0 = vld [vmem:[%s1177_s7] sm:$0x3f] }
  0x1a   : > { %253 = vst [vmem:[#allocation1] ss:$4 sm:$0xff] %v248_v0  ;;  %v357_v4 = vld [vmem:[%s1177_s7] sm:$0x3f] }
  0x1b   : > { %v424_v8 = vld [vmem:[%s1177_s7] sm:$0x3f] }
  0x1c   : > { %v532_v15 = vld [vmem:[%s1177_s7] sm:$0x3f] }
  0x1d   : > { %v591_v19 = vld [vmem:[%s1177_s7] sm:$0x3f] }
  0x1e   : > { %v699_v26 = vld [vmem:[%s1177_s7] sm:$0x3f] }
  0x21   : > { %v258_v1 = vld.sshfl [vmem:[#allocation1 + $0x10] sm:$0xff pattern:$0x73625140]  ;;  %v254_v2 = vld.sshfl [vmem:[#allocation1] sm:$0xff pattern:$0x73625140] }
  0x22   : > { %264 = vrot.lane.b32.xlu1 %v258_v1, %s1082_s8  ;;  %260 = vrot.lane.b32.xlu0 %v254_v2, %s1082_s8  ;;  %v256_v3 = vld.sshfl [vmem:[#allocation1 + $0x8] sm:$0xff pattern:$0x73625140] }
  0x23   : > { %306 = vst [vmem:[#allocation1] ss:$4 sm:$0xff] %v248_v0  ;;  %v911_v0 = vld [vmem:[%s1301_s1 + $0x10] sm:$0xf] }
  0x2a   : > { %262 = vrot.lane.b32.xlu0 %v256_v3, %s1082_s8  ;;  %v307_v5 = vld.sshfl [vmem:[#allocation1] sm:$0xff pattern:$0x73625140]  ;;  %v309_v6 = vld.sshfl [vmem:[#allocation1 + $0x8] sm:$0xff pattern:$0x73625140] }
  0x2b   : > { %313 = vrot.lane.b32.xlu1 %v307_v5, %s1083_s9  ;;  %v311_v7 = vld.sshfl [vmem:[#allocation1 + $0x10] sm:$0xff pattern:$0x73625140]  ;;  %315 = vrot.lane.b32.xlu2 %v309_v6, %s1083_s9 }
  0x2c   : > { %361 = vst [vmem:[#allocation1] ss:$4 sm:$0xff] %v357_v4 }
  0x33   : > { %v366_v9 = vld.sshfl [vmem:[#allocation1 + $0x10] sm:$0xff pattern:$0x73625140]  ;;  %v364_v10 = vld.sshfl [vmem:[#allocation1 + $0x8] sm:$0xff pattern:$0x73625140]  ;;  %317 = vrot.lane.b32.xlu2 %v311_v7, %s1083_s9 }
  0x34   : > { %370 = vrot.lane.b32.xlu1 %v364_v10, %s1084_s10  ;;  %v362_v11 = vld.sshfl [vmem:[#allocation1] sm:$0xff pattern:$0x73625140]  ;;  %s223_s9 = sand.u32 1, %s1064_s16  }
  0x35   : > { %368 = vrot.lane.b32.xlu0 %v362_v11, %s1084_s10  ;;  %430 = vst [vmem:[#allocation1] ss:$4 sm:$0xff] %v424_v8  ;;  %s787_s24 = scalar_lea.sflag [#allocation4], %s223_s9 }
  0x3b   : > { %372 = vrot.lane.b32.xlu2 %v366_v9, %s1084_s10  ;;  %v910_v9 = vld [vmem:[%s1301_s1 + $0x4] sm:$0xf]  ;;  %s900_s10 = sshll.u32 %s223_s9, 4 }
  0x3c   : > { %v433_v12 = vld.sshfl [vmem:[#allocation1 + $0x8] sm:$0xff pattern:$0x73625140]  ;;  %v435_v13 = vld.sshfl [vmem:[#allocation1 + $0x10] sm:$0xff pattern:$0x73625140] }
  0x3d   : > { %439 = vrot.lane.b32.xlu1 %v433_v12, %s1085_s11  ;;  %v431_v14 = vld.sshfl [vmem:[#allocation1] sm:$0xff pattern:$0x73625140] }
  0x3e   : > { %437 = vrot.lane.b32.xlu0 %v431_v14, %s1085_s11  ;;  %481 = vst [vmem:[#allocation1] ss:$4 sm:$0xff] %v424_v8 }
  0x43   : > { %441 = vrot.lane.b32.xlu2 %v435_v13, %s1085_s11  ;;  %s934_s11 = sshll.u32 %s1072_s18, 4 }
  0x45   : > { %v484_v16 = vld.sshfl [vmem:[#allocation1 + $0x8] sm:$0xff pattern:$0x73625140]  ;;  %v486_v17 = vld.sshfl [vmem:[#allocation1 + $0x10] sm:$0xff pattern:$0x73625140] }
  0x46   : > { %490 = vrot.lane.b32.xlu1 %v484_v16, %s1086_s12  ;;  %v482_v18 = vld.sshfl [vmem:[#allocation1] sm:$0xff pattern:$0x73625140] }
  0x47   : > { %488 = vrot.lane.b32.xlu0 %v482_v18, %s1086_s12  ;;  %536 = vst [vmem:[#allocation1] ss:$4 sm:$0xff] %v532_v15  ;;  %v774_v15 = vld [vmem:[%s1303_s3] sm:$0xff]  ;;  %v1091_v18 = vmov 0  }
  0x48   : > { %1001 = vset.pattern.permute.xlu0 %v1091_v18 }
  0x4b   : > { %492 = vrot.lane.b32.xlu2 %v486_v17, %s1086_s12  ;;  %v916_v17 = vld [vmem:[%s1301_s1 + $0x1c] sm:$0xf] }
  0x4e   : > { %v539_v20 = vld.sshfl [vmem:[#allocation1 + $0x8] sm:$0xff pattern:$0x73625140]  ;;  %v541_v21 = vld.sshfl [vmem:[#allocation1 + $0x10] sm:$0xff pattern:$0x73625140] }
  0x4f   : > { %545 = vrot.lane.b32.xlu1 %v539_v20, %s1087_s13  ;;  %v537_v22 = vld.sshfl [vmem:[#allocation1] sm:$0xff pattern:$0x73625140] }
  0x50   : > { %543 = vrot.lane.b32.xlu0 %v537_v22, %s1087_s13  ;;  %597 = vst [vmem:[#allocation1] ss:$4 sm:$0xff] %v591_v19 }
  0x53   : > { %547 = vrot.lane.b32.xlu2 %v541_v21, %s1087_s13 }
  0x57   : > { %v600_v23 = vld.sshfl [vmem:[#allocation1 + $0x8] sm:$0xff pattern:$0x73625140]  ;;  %v602_v24 = vld.sshfl [vmem:[#allocation1 + $0x10] sm:$0xff pattern:$0x73625140] }
  0x58   : > { %606 = vrot.lane.b32.xlu1 %v600_v23, %s1088_s14  ;;  %v598_v25 = vld.sshfl [vmem:[#allocation1] sm:$0xff pattern:$0x73625140] }
  0x59   : > { %604 = vrot.lane.b32.xlu0 %v598_v25, %s1088_s14  ;;  %648 = vst [vmem:[#allocation1] ss:$4 sm:$0xff] %v591_v19 }
  0x5b   : > { %608 = vrot.lane.b32.xlu2 %v602_v24, %s1088_s14  ;;  %s798_s14 = scalar_lea.hbm %s1304_s4, %s934_s11 }
  0x5c   : > { %s802_s18 = sshll.u32 %s798_s14, 4  ;;  %s803_s18 = int_to_ptr.hbm [resolvable:$true] %s802_s18 }
  0x5d   : > { %s1016_s26 = sshra.s32 %s803_s18, 4  ;;  %s1017_s26 = int_to_ptr.hbm [resolvable:$true] %s1016_s26 }
  0x5e   : > { %s1018_s29 = scalar_lea.hbm %s1017_s26, 16  ;;  %p1023_p1 = scmp.lt.s32.totalorder %s1017_s26, %s1304_s4 }
  0x5f   : > { %p1019_p12 = scmp.ne.s32.totalorder %s1017_s26, %s1018_s29  ;;  %p1024_p2 = scmp.lt.s32.totalorder %s1022_s6, %s1018_s29 }
  0x60   : > { %v653_v27 = vld.sshfl [vmem:[#allocation1 + $0x10] sm:$0xff pattern:$0x73625140]  ;;  %v651_v28 = vld.sshfl [vmem:[#allocation1 + $0x8] sm:$0xff pattern:$0x73625140] }
  0x61   : > { %657 = vrot.lane.b32.xlu1 %v651_v28, %s1089_s21  ;;  %v649_v29 = vld.sshfl [vmem:[#allocation1] sm:$0xff pattern:$0x73625140]  ;;  %p1020_p13 = pnand %p1019_p12, %p1157_p4  ;;  %p1025_p3 = por %p1024_p2, %p1023_p1 }
  0x62   : > { %655 = vrot.lane.b32.xlu0 %v649_v29, %s1089_s21  ;;  %703 = vst [vmem:[#allocation1] ss:$4 sm:$0xff] %v699_v26  ;;  %v920_v26 = vld [vmem:[%s1301_s1 + $0x14] sm:$0xf] }
  0x63   : > { %659 = vrot.lane.b32.xlu2 %v653_v27, %s1089_s21  ;;  %s225_s21 = scalar_lea.vmem [#allocation3], %s900_s10  ;;  %p1021_p0 = pneg %p1020_p13 }
  0x65   : > { %p1026_p5 = pnand %p1025_p3, %p1021_p0 }
  0x69   : > { %v706_v30 = vld.sshfl [vmem:[#allocation1 + $0x8] sm:$0xff pattern:$0x73625140]  ;;  %v704_v31 = vld.sshfl [vmem:[#allocation1] sm:$0xff pattern:$0x73625140] }
  0x6a   : > { %712 = vrot.lane.b32.xlu1 %v706_v30, %s1090_s22  ;;  %710 = vrot.lane.b32.xlu0 %v704_v31, %s1090_s22  ;;  %v708_v32 = vld.sshfl [vmem:[#allocation1 + $0x10] sm:$0xff pattern:$0x73625140] }
  0x6b   : > { %714 = vrot.lane.b32.xlu2 %v708_v32, %s1090_s22  ;;  %s800_s22 = sshll.u32 %s225_s21, 4  ;;  %s801_s22 = int_to_ptr.vmem [resolvable:$true] %s800_s22 }
  0x72   : > { %777 = vperm.xlu0 %1001, %v774_v15  }
  0x85   : > { %v316_v33 = vpop.permute.xlu2 %315 }
  0x8d   : > { %v318_v34 = vpop.permute.xlu2 %317 }
  0x8e   : > { %v321_v35 = vsel %vm319_vm0, %v316_v33, %v318_v34  ;;  %v919_v34 = vld [vmem:[%s1301_s1 + $0x8] sm:$0xf] }
  0x8f   : > { %v329_v36 = vsel %vm273_vm1, %v321_v35, 0 }
  0x90   : > { %351 = vmatpush.bf16.msra.mxu3 %v329_v36 }
  0x93   : > { %906 = vmatmul.msk.bf16.vlgmr.msra.gmra.mxu3 %vm269_vm2, %v249_v37 }
  0x94   : > { %v265_v38 = vpop.permute.xlu1 %264  ;;  %v261_v39 = vpop.permute.xlu0 %260 }
  0x95   : > { %v373_v49 = vpop.permute.xlu2 %372 }
  0x9c   : > { %v263_v40 = vpop.permute.xlu0 %262 }
  0x9d   : > { %v314_v41 = vpop.permute.xlu1 %313  ;;  %v267_v42 = vsel %vm266_vm3, %v261_v39, %v263_v40  ;;  %v268_v43 = vsel %vm266_vm3, %v263_v40, %v265_v38  ;;  %v442_v56 = vpop.permute.xlu2 %441 }
  0x9e   : > { %v275_v44 = vsel %vm273_vm1, %v267_v42, 0  ;;  %v278_v45 = vsel %vm273_vm1, %v268_v43, 0  ;;  %v320_v46 = vsel %vm319_vm0, %v314_v41, %v316_v33  ;;  %v925_v42 = vld [vmem:[%s1301_s1 + $0x20] sm:$0xf] }
  0x9f   : > { %287 = vmatpush.bf16.msra.mxu0 %v275_v44  ;;  %300 = vmatpush.bf16.msra.mxu1 %v278_v45  ;;  %v326_v47 = vsel %vm273_vm1, %v320_v46, 0 }
  0xa0   : > { %338 = vmatpush.bf16.msra.mxu2 %v326_v47 }
  0xa2   : > { %903 = vmatmul.msk.bf16.vlgmr.msra.gmra.mxu0 %vm269_vm2, %v902_v48  ;;  %904 = vmatmul.msk.bf16.vlgmr.msra.gmra.mxu1 %vm269_vm2, %v902_v48 }
  0xa3   : > { %905 = vmatmul.msk.bf16.vlgmr.msra.gmra.mxu2 %vm269_vm2, %v249_v37 }
  0xa5   : > { %v493_v1 = vpop.permute.xlu2 %492 }
  0xa6   : > { %v371_v50 = vpop.permute.xlu1 %370 }
  0xa7   : > { %v369_v51 = vpop.permute.xlu0 %368  ;;  %v376_v52 = vsel %vm374_vm4, %v371_v50, %v373_v49 }
  0xa8   : > { %v375_v53 = vsel %vm374_vm4, %v369_v51, %v371_v50  ;;  %v384_v54 = vsel %vm273_vm1, %v376_v52, 0 }
  0xa9   : > { %v381_v55 = vsel %vm273_vm1, %v375_v53, 0  ;;  %406 = vmatpush.bf16.msrb.mxu1 %v384_v54 }
  0xaa   : > { %393 = vmatpush.bf16.msrb.mxu0 %v381_v55 }
  0xad   : > { %v548_v8 = vpop.permute.xlu2 %547 }
  0xaf   : > { %v440_v57 = vpop.permute.xlu1 %439 }
  0xb0   : > { %v438_v59 = vpop.permute.xlu0 %437  ;;  %v445_v60 = vsel %vm443_vm5, %v440_v57, %v442_v56 }
  0xb1   : > { %v444_v61 = vsel %vm443_vm5, %v438_v59, %v440_v57  ;;  %v453_v62 = vsel %vm273_vm1, %v445_v60, 0 }
  0xb2   : > { %v450_v63 = vsel %vm273_vm1, %v444_v61, 0  ;;  %475 = vmatpush.bf16.msrb.mxu3 %v453_v62  ;;  %908 = vmatmul.msk.bf16.vlgmr.msrb.gmra.mxu0 %vm269_vm2, %v907_v58 }
  0xb3   : > { %462 = vmatpush.bf16.msrb.mxu2 %v450_v63  ;;  %909 = vmatmul.msk.bf16.vlgmr.msrb.gmra.mxu1 %vm269_vm2, %v907_v58 }
  0xb5   : > { %913 = vmatmul.msk.bf16.vlgmr.msrb.gmra.mxu3 %vm269_vm2, %v911_v0  ;;  %v609_v19 = vpop.permute.xlu2 %608 }
  0xb6   : > { %912 = vmatmul.msk.bf16.vlgmr.msrb.gmra.mxu2 %vm269_vm2, %v911_v0 }
  0xb8   : > { %v491_v2 = vpop.permute.xlu1 %490 }
  0xb9   : > { %v496_v3 = vsel %vm494_vm6, %v491_v2, %v493_v1  ;;  %v489_v4 = vpop.permute.xlu0 %488 }
  0xba   : > { %v504_v5 = vsel %vm273_vm1, %v496_v3, 0  ;;  %v495_v6 = vsel %vm494_vm6, %v489_v4, %v491_v2 }
  0xbb   : > { %v501_v7 = vsel %vm273_vm1, %v495_v6, 0  ;;  %526 = vmatpush.bf16.msra.mxu1 %v504_v5 }
  0xbc   : > { %513 = vmatpush.bf16.msra.mxu0 %v501_v7  ;;  %v414_v7 = vld [vmem:[%s1302_s2] ss:$2 sm:$0x3] }
  0xbd   : > { %v660_v27 = vpop.permute.xlu2 %659 }
  0xc1   : > { %v546_v10 = vpop.permute.xlu1 %545 }
  0xc2   : > { %v551_v11 = vsel %vm549_vm7, %v546_v10, %v548_v8  ;;  %v544_v12 = vpop.permute.xlu0 %543  ;;  %914 = vmatmul.msk.bf16.vlgmr.msra.gmra.mxu0 %vm269_vm2, %v910_v9 }
  0xc3   : > { %v559_v13 = vsel %vm273_vm1, %v551_v11, 0  ;;  %v550_v14 = vsel %vm549_vm7, %v544_v12, %v546_v10  ;;  %915 = vmatmul.msk.bf16.vlgmr.msra.gmra.mxu1 %vm269_vm2, %v910_v9  ;;  %v928_v10 = vld [vmem:[%s1302_s2 + $0x1] ss:$2 sm:$0x3]  ;;  %v416_v12 = vperm.slane %v414_v7, 0 }
  0xc4   : > { %v556_v16 = vsel %vm273_vm1, %v550_v14, 0  ;;  %581 = vmatpush.bf16.msra.mxu3 %v559_v13 }
  0xc5   : > { %568 = vmatpush.bf16.msra.mxu2 %v556_v16  ;;  %v715_v35 = vpop.permute.xlu2 %714  ;;  %v417_v16 = vperm.slane %v414_v7, 1 }
  0xc7   : > { %918 = vmatmul.msk.bf16.vlgmr.msra.gmra.mxu3 %vm269_vm2, %v916_v17 }
  0xc8   : > { %917 = vmatmul.msk.bf16.vlgmr.msra.gmra.mxu2 %vm269_vm2, %v916_v17 }
  0xca   : > { %v607_v20 = vpop.permute.xlu1 %606 }
  0xcb   : > { %v612_v21 = vsel %vm610_vm8, %v607_v20, %v609_v19  ;;  %v605_v22 = vpop.permute.xlu0 %604 }
  0xcc   : > { %v620_v23 = vsel %vm273_vm1, %v612_v21, 0  ;;  %v611_v24 = vsel %vm610_vm8, %v605_v22, %v607_v20  ;;  %v759_v21 = vperm.slane %v928_v10, 0 }
  0xcd   : > { %v617_v25 = vsel %vm273_vm1, %v611_v24, 0  ;;  %642 = vmatpush.bf16.msrb.mxu1 %v620_v23 }
  0xce   : > { %629 = vmatpush.bf16.msrb.mxu0 %v617_v25  ;;  %v760_v25 = vperm.slane %v928_v10, 1 }
  0xd2   : > { %921 = vmatmul.msk.bf16.vlgmr.msrb.gmra.mxu0 %vm269_vm2, %v920_v26 }
  0xd3   : > { %v658_v28 = vpop.permute.xlu1 %657  ;;  %922 = vmatmul.msk.bf16.vlgmr.msrb.gmra.mxu1 %vm269_vm2, %v920_v26 }
  0xd4   : > { %v663_v29 = vsel %vm661_vm9, %v658_v28, %v660_v27  ;;  %v656_v30 = vpop.permute.xlu0 %655 }
  0xd5   : > { %v671_v31 = vsel %vm273_vm1, %v663_v29, 0  ;;  %v662_v32 = vsel %vm661_vm9, %v656_v30, %v658_v28 }
  0xd6   : > { %v668_v33 = vsel %vm273_vm1, %v662_v32, 0  ;;  %693 = vmatpush.bf16.msrb.mxu3 %v671_v31 }
  0xd7   : > { %680 = vmatpush.bf16.msrb.mxu2 %v668_v33 }
  0xd9   : > { %924 = vmatmul.msk.bf16.vlgmr.msrb.gmra.mxu3 %vm269_vm2, %v919_v34 }
  0xda   : > { %923 = vmatmul.msk.bf16.vlgmr.msrb.gmra.mxu2 %vm269_vm2, %v919_v34 }
  0xdc   : > { %v713_v36 = vpop.permute.xlu1 %712  ;;  %v711_v37 = vpop.permute.xlu0 %710 }
  0xdd   : > { %v718_v38 = vsel %vm716_vm10, %v713_v36, %v715_v35  ;;  %v717_v39 = vsel %vm716_vm10, %v711_v37, %v713_v36 }
  0xde   : > { %v726_v40 = vsel %vm273_vm1, %v718_v38, 0  ;;  %v723_v41 = vsel %vm273_vm1, %v717_v39, 0 }
  0xdf   : > { %735 = vmatpush.bf16.msra.mxu0 %v723_v41  ;;  %748 = vmatpush.bf16.msra.mxu1 %v726_v40 }
  0xe2   : > { %926 = vmatmul.msk.bf16.vlgmr.msra.gmra.mxu0 %vm269_vm2, %v925_v42 }
  0xe3   : > { %927 = vmatmul.msk.bf16.vlgmr.msra.gmra.mxu1 %vm269_vm2, %v925_v42 }
  0xe4   : > { %v778_v35 = vpop.permute.xlu0 %777 }
 0x116   : > { %v353_v43 = vpop.f32.mrf.mxu3 }
 0x11e   : > { %v355_v44 = vpop.f32.mrf.mxu3 }
 0x11f   : > { %v289_v45 = vpop.f32.mrf.mxu0  ;;  %v302_v46 = vpop.f32.mrf.mxu1 }
 0x120   : > { %v354_v9 = vadd.f32 %v353_v43, %v302_v46 }
 0x126   : > { %v340_v47 = vpop.f32.mrf.mxu2 }
 0x127   : > { %v291_v48 = vpop.f32.mrf.mxu0  ;;  %v304_v49 = vpop.f32.mrf.mxu1  ;;  %v341_v8 = vadd.f32 %v340_v47, %v289_v45 }
 0x12e   : > { %v342_v50 = vpop.f32.mrf.mxu2 }
 0x12f   : > { %v395_v51 = vpop.f32.mrf.mxu0 }
 0x130   : > { %v408_v52 = vpop.f32.mrf.mxu1  ;;  %v412_v11 = vadd.f32 %v395_v51, %v341_v8 }
 0x131   : > { %v413_v15 = vadd.f32 %v408_v52, %v354_v9 }
 0x132   : > { %v420_v26 = vmul.f32 %v416_v12, %v412_v11 }
 0x133   : > { %v421_v29 = vmul.f32 %v417_v16, %v413_v15 }
 0x137   : > { %v397_v53 = vpop.f32.mrf.mxu0 }
 0x138   : > { %v477_v54 = vpop.f32.mrf.mxu3  ;;  %v410_v55 = vpop.f32.mrf.mxu1 }
 0x139   : > { %v464_v56 = vpop.f32.mrf.mxu2 }
 0x13f   : > { %v515_v57 = vpop.f32.mrf.mxu0 }
 0x140   : > { %v479_v58 = vpop.f32.mrf.mxu3  ;;  %v528_v59 = vpop.f32.mrf.mxu1  ;;  %v516_v13 = vadd.f32 %v515_v57, %v464_v56 }
 0x141   : > { %v466_v60 = vpop.f32.mrf.mxu2  ;;  %v529_v17 = vadd.f32 %v528_v59, %v477_v54 }
 0x147   : > { %v517_v61 = vpop.f32.mrf.mxu0 }
 0x148   : > { %v530_v62 = vpop.f32.mrf.mxu1 }
 0x14a   : > { %v583_v63 = vpop.f32.mrf.mxu3 }
 0x14b   : > { %v570_v0 = vpop.f32.mrf.mxu2  ;;  %v588_v22 = vadd.f32 %v583_v63, %v529_v17 }
 0x14c   : > { %v587_v19 = vadd.f32 %v570_v0, %v516_v13 }
 0x14d   : > { %v590_v33 = vadd.f32 %v588_v22, %v421_v29 }
 0x14e   : > { %v589_v31 = vadd.f32 %v587_v19, %v420_v26 }
 0x14f   : > { %v631_v1 = vpop.f32.mrf.mxu0 }
 0x150   : > { %v644_v2 = vpop.f32.mrf.mxu1 }
 0x152   : > { %v585_v3 = vpop.f32.mrf.mxu3 }
 0x153   : > { %v572_v4 = vpop.f32.mrf.mxu2 }
 0x157   : > { %v633_v5 = vpop.f32.mrf.mxu0 }
 0x158   : > { %v646_v6 = vpop.f32.mrf.mxu1 }
 0x15c   : > { %v695_v14 = vpop.f32.mrf.mxu3 }
 0x15d   : > { %v682_v18 = vpop.f32.mrf.mxu2  ;;  %v696_v23 = vadd.f32 %v695_v14, %v644_v2 }
 0x15e   : > { %v683_v20 = vadd.f32 %v682_v18, %v631_v1 }
 0x15f   : > { %v737_v24 = vpop.f32.mrf.mxu0 }
 0x160   : > { %v754_v27 = vadd.f32 %v737_v24, %v683_v20  ;;  %v750_v28 = vpop.f32.mrf.mxu1 }
 0x161   : > { %v755_v30 = vadd.f32 %v750_v28, %v696_v23 }
 0x162   : > { %v763_v32 = vmul.f32 %v759_v21, %v754_v27 }
 0x163   : > { %v764_v34 = vmul.f32 %v760_v25, %v755_v30 }
 0x164   : > { %v697_v36 = vpop.f32.mrf.mxu3  ;;  %v765_v37 = vadd.f32 %v763_v32, %v589_v31 }
 0x165   : > { %v684_v38 = vpop.f32.mrf.mxu2  ;;  %v766_v39 = vadd.f32 %v764_v34, %v590_v33 }
 0x166   : > { %v780_v40 = vadd.f32 %v778_v35, %v765_v37 }
 0x167   : > { %v781_v41 = vadd.f32 %v778_v35, %v766_v39  ;;  %v739_v42 = vpop.f32.mrf.mxu0 }
 0x168   : > { %v782_v43 = vmax.f32 %v780_v40, 0.0  ;;  %v752_v44 = vpop.f32.mrf.mxu1 }
 0x169   : > { %v783_v45 = vmax.f32 %v781_v41, 0.0 }
 0x16a   : > { %784 = vst [vmem:[%s225_s21] sm:$0xff] %v782_v43 }
 0x16b   : > { %785 = vst [vmem:[%s225_s21 + $0x8] sm:$0xff] %v783_v45 }
 0x16c   : > { %1029 = shalt.err (!%p1026_p5)
}
 0x16d   : > { %936 = dma.vmem_to_hbm [thread:$0]  (%p1157_p4), %s801_s22, 256, %s803_s18, %s787_s24  }
 0x16e PF: > { %p942_p6 = scmp.ge.s32.totalorder %s1080_s20, 2  ;;  %s814_s9 = sand.u32 1, %s1060_s15  }
 0x16f   : > { %s815_s10 = scalar_lea.sflag [#allocation4], %s814_s9 }
 0x170   : > { %p939_p7 = pnand %p942_p6, %p1164_p8 }
 0x172   : > { %p940_p9 = pneg %p939_p7 }
 0x174   : > { %1055 = dma.done.wait (%p940_p9), %s815_s10, 256  }
 0x175   : > { %1057 = vsyncadd (%p940_p9), %s815_s10, 4294967040  ;;  %s17_s20 = sadd.s32 1, %s1080_s20   ;;  %s1307_s15 = smov %s1064_s16 }
 0x176   : > { %p14_p10 = scmp.ge.s32.totalorder %s17_s20, 4   ;;  %s1308_s16 = smov %s1068_s17 }
 0x177   : > { %s1309_s17 = smov %s1170_s28  ;;  %s1310_s18 = smov %s1076_s19 }
 0x178   : > { %s1311_s19 = smov %s1313_s23  ;;  %16 = sbr.rel (!%p14_p10) target bundleno = 4 (0x4), region = 91 }
 0x17d   :  { %821 = vsyncpa [#allocation4], 1 }
 0x17e   :  { %823 = vsyncpa [#allocation4 + $0x1], 1 }

</bundles_post_ra>
